<compile_context>
chip_gen: v7x
topology: tpu7x:2x2x1
jax: 0.10.0
libtpu: 0.0.40
codegen_flags: <defaults>
</compile_context>

<pallas_src>
import jax
import jax.numpy as jnp
from jax.experimental import pallas as pl
from jax.experimental.pallas import tpu as pltpu


# Modest, generation-safe scoped-VMEM request: double-buffered 512-row f32
# tiles (in + out + ids) plus the resident [B,H] gate is ~2 MiB, so 32 MiB
# leaves large headroom and is below v7x's 64 MiB physical VMEM per core.
_VMEM_LIMIT = 32 * 1024 * 1024
_TILE_ROWS = 512  # measured sweet spot (~85% of HBM roofline for streaming)


def _round_up(x, m):
    return ((x + m - 1) // m) * m


def _pick_tile(n, target=_TILE_ROWS):
    # rows per tile: multiple of 8 sublanes, at most `target`
    return min(target, _round_up(max(n, 1), 8))


# --------------------------------------------------------------------------
# Kernel 1: tiled segment-sum of node features   sum[b, :] += h_V[i, :]  (b = batch_id[i])
# Grid axis over node tiles is a reduction ("arbitrary"); output block is resident.
# --------------------------------------------------------------------------
def _segment_sum_kernel(hv_ref, id_ref, sum_ref):
    @pl.when(pl.program_id(0) == 0)
    def _():
        sum_ref[...] = jnp.zeros_like(sum_ref)

    ids = id_ref[...]                           # [t, 1] int32 (padding rows hold Bp -> all-zero mask)
    t = ids.shape[0]
    bp = sum_ref.shape[0]
    mask = (ids == jax.lax.broadcasted_iota(jnp.int32, (t, bp), 1)).astype(jnp.float32)  # [t, Bp]
    # mask^T @ h_V  ->  [Bp, H] partial sums (contraction over the tile rows)
    sum_ref[...] += jax.lax.dot_general(
        mask, hv_ref[...], (((0,), (0,)), ((), ())),
        preferred_element_type=jnp.float32)


# --------------------------------------------------------------------------
# Kernel 2: tiny per-batch gate MLPs (runs once; everything VMEM-resident)
# --------------------------------------------------------------------------
def _gates_kernel(sum_ref, inv_ref,
                  wv1, bv1, wv2, bv2, wv3, bv3,
                  we1, be1, we2, be2, we3, be3,
                  gv_out, ge_out):
    def mlp_g(x, w1, b1, w2, b2, w3, b3):
        h = jnp.maximum(jnp.dot(x, w1[...], preferred_element_type=jnp.float32) + b1[...], 0.0)
        h = jnp.maximum(jnp.dot(h, w2[...], preferred_element_type=jnp.float32) + b2[...], 0.0)
        h = jnp.dot(h, w3[...], preferred_element_type=jnp.float32) + b3[...]
        return jax.nn.sigmoid(h)

    c_v1 = sum_ref[...] * inv_ref[...]                       # [Bp, Hp] segment mean
    g_v = mlp_g(c_v1, wv1, bv1, wv2, bv2, wv3, bv3)          # node gate per batch
    # Exact because g_v is constant within a batch:
    #   scatter_mean(h_V * g_v[batch_id]) == scatter_mean(h_V) * g_v == c_v1 * g_v
    c_v2 = c_v1 * g_v
    g_e = mlp_g(c_v2, we1, be1, we2, be2, we3, be3)          # edge gate per batch
    gv_out[...] = g_v
    ge_out[...] = g_e


# --------------------------------------------------------------------------
# Kernels 3 & 4 (shared body): stream rows, gather resident per-batch gate,
# multiply.  Pure memory-bound stream; grid axis is "parallel".
# --------------------------------------------------------------------------
def _apply_gate_kernel(h_ref, id_ref, g_ref, out_ref):
    ids = id_ref[...]                            # [t, 1] int32
    t = ids.shape[0]
    bp = g_ref.shape[0]
    mask = (ids == jax.lax.broadcasted_iota(jnp.int32, (t, bp), 1)).astype(jnp.float32)  # [t, Bp]
    gate = jnp.dot(mask, g_ref[...], preferred_element_type=jnp.float32)                 # [t, Hp]
    out_ref[...] = h_ref[...] * gate


# --------------------------------------------------------------------------
# Wrapper
# --------------------------------------------------------------------------
def context_forward(h_V, h_E, edge_idx, batch_id, params, num_batches):
    """Pallas implementation of Context.forward with node_context=edge_context=True."""
    f32 = jnp.float32
    N, H = h_V.shape
    E = h_E.shape[0]
    B = int(num_batches)

    Hp = _round_up(H, 128)                 # lane-dense last dim
    Bp = _round_up(max(B, 1), 8)           # sublane-aligned batch dim
    tn = _pick_tile(N)
    te = _pick_tile(E)
    Np = _round_up(N, tn)
    Ep = _round_up(E, te)

    # ---- glue: pad dense tensors; index plumbing for batch ids ------------
    hV_p = jnp.zeros((Np, Hp), f32).at[:N, :H].set(h_V.astype(f32))
    hE_p = jnp.zeros((Ep, Hp), f32).at[:E, :H].set(h_E.astype(f32))

    bid = batch_id.astype(jnp.int32)
    # sentinel Bp (out of range) for padded rows -> all-zero one-hot mask
    bid_n = jnp.full((Np, 1), Bp, jnp.int32).at[:N, 0].set(bid)
    edge_bid = bid[edge_idx[0]]
    bid_e = jnp.full((Ep, 1), Bp, jnp.int32).at[:E, 0].set(edge_bid)

    # per-batch inverse node counts (metadata derived from batch_id only)
    counts = jax.ops.segment_sum(jnp.ones((N,), f32), bid, num_segments=Bp)
    inv = (1.0 / jnp.maximum(counts, 1.0)).reshape(Bp, 1)

    # pad MLP params to Hp (padded rows/cols are zero -> padded feature columns
    # stay exactly zero through the MLP and are sliced off at the end)
    def pad_w(w):
        return jnp.zeros((Hp, Hp), f32).at[:H, :H].set(w)

    def pad_b(b):
        return jnp.zeros((1, Hp), f32).at[:, :H].set(b.reshape(1, H))

    padded = [pad_w(p) if i % 2 == 0 else pad_b(p) for i, p in enumerate(params)]
    (wv1, bv1, wv2, bv2, wv3, bv3, we1, be1, we2, be2, we3, be3) = padded

    cp_reduce = pltpu.CompilerParams(
        dimension_semantics=("arbitrary",), vmem_limit_bytes=_VMEM_LIMIT)
    cp_stream = pltpu.CompilerParams(
        dimension_semantics=("parallel",), vmem_limit_bytes=_VMEM_LIMIT)

    # ---- 1) segment sum over nodes ----------------------------------------
    seg_sum = pl.pallas_call(
        _segment_sum_kernel,
        out_shape=jax.ShapeDtypeStruct((Bp, Hp), f32),
        grid=(Np // tn,),
        in_specs=[pl.BlockSpec((tn, Hp), lambda i: (i, 0)),
                  pl.BlockSpec((tn, 1), lambda i: (i, 0))],
        out_specs=pl.BlockSpec((Bp, Hp), lambda i: (0, 0)),
        compiler_params=cp_reduce,
    )(hV_p, bid_n)

    # ---- 2) per-batch gates (tiny, single invocation) ----------------------
    vmem = pl.BlockSpec(memory_space=pltpu.MemorySpace.VMEM)
    g_v, g_e = pl.pallas_call(
        _gates_kernel,
        out_shape=(jax.ShapeDtypeStruct((Bp, Hp), f32),
                   jax.ShapeDtypeStruct((Bp, Hp), f32)),
        in_specs=[vmem] * 14,
        out_specs=(vmem, vmem),
        compiler_params=pltpu.CompilerParams(vmem_limit_bytes=_VMEM_LIMIT),
    )(seg_sum, inv, wv1, bv1, wv2, bv2, wv3, bv3, we1, be1, we2, be2, we3, be3)

    # ---- 3) gate node features (parallel stream over N tiles) --------------
    hV_new = pl.pallas_call(
        _apply_gate_kernel,
        out_shape=jax.ShapeDtypeStruct((Np, Hp), f32),
        grid=(Np // tn,),
        in_specs=[pl.BlockSpec((tn, Hp), lambda i: (i, 0)),
                  pl.BlockSpec((tn, 1), lambda i: (i, 0)),
                  pl.BlockSpec((Bp, Hp), lambda i: (0, 0))],
        out_specs=pl.BlockSpec((tn, Hp), lambda i: (i, 0)),
        compiler_params=cp_stream,
        input_output_aliases={0: 0},
    )(hV_p, bid_n, g_v)

    # ---- 4) gate edge features (parallel stream over E tiles) --------------
    hE_new = pl.pallas_call(
        _apply_gate_kernel,
        out_shape=jax.ShapeDtypeStruct((Ep, Hp), f32),
        grid=(Ep // te,),
        in_specs=[pl.BlockSpec((te, Hp), lambda i: (i, 0)),
                  pl.BlockSpec((te, 1), lambda i: (i, 0)),
                  pl.BlockSpec((Bp, Hp), lambda i: (0, 0))],
        out_specs=pl.BlockSpec((te, Hp), lambda i: (i, 0)),
        compiler_params=cp_stream,
        input_output_aliases={0: 0},
    )(hE_p, bid_e, g_e)

    return hV_new[:N, :H], hE_new[:E, :H]


# --------------------------------------------------------------------------
# Test harness
# --------------------------------------------------------------------------
def _init_params(key, H):
    """Deterministic PyTorch-Linear-style init for V_MLP_g and E_MLP_g (3 layers each)."""
    bound = 1.0 / (H ** 0.5)
    keys = jax.random.split(key, 12)
    params = []
    for i in range(6):  # 6 Linear layers total
        w = jax.random.uniform(keys[2 * i], (H, H), jnp.float32, -bound, bound)
        b = jax.random.uniform(keys[2 * i + 1], (1, H), jnp.float32, -bound, bound)
        params += [w, b]
    return tuple(params)


def _reference(h_V, h_E, edge_idx, batch_id, params, B):
    """Pure-JAX reference matching the torch forward (updated-h_V edge context)."""
    (wv1, bv1, wv2, bv2, wv3, bv3, we1, be1, we2, be2, we3, be3) = params

    def mlp_g(x, w1, b1, w2, b2, w3, b3):
        h = jnp.maximum(x @ w1 + b1, 0.0)
        h = jnp.maximum(h @ w2 + b2, 0.0)
        return jax.nn.sigmoid(h @ w3 + b3)

    def seg_mean(x):
        s = jax.ops.segment_sum(x, batch_id, num_segments=B)
        c = jax.ops.segment_sum(jnp.ones((x.shape[0],)), batch_id, num_segments=B)
        return s / jnp.maximum(c, 1.0)[:, None]

    cV1 = seg_mean(h_V)
    hV_new = h_V * mlp_g(cV1, wv1, bv1, wv2, bv2, wv3, bv3)[batch_id]
    cV2 = seg_mean(hV_new)
    hE_new = h_E * mlp_g(cV2, we1, be1, we2, be2, we3, be3)[batch_id[edge_idx[0]]]
    return hV_new, hE_new


if __name__ == "__main__":
    key = jax.random.PRNGKey(0)
    kV, kE, kI, kP = jax.random.split(key, 4)

    N, E, H, B = 16, 32, 32, 2  # nodes, edges, hidden, batches

    h_V = jax.random.normal(kV, (N, H), dtype=jnp.float32)
    h_E = jax.random.normal(kE, (E, H), dtype=jnp.float32)
    batch_id = jnp.concatenate([jnp.zeros((N // 2,), jnp.int32),
                                jnp.ones((N - N // 2,), jnp.int32)])
    edge_idx = jax.random.randint(kI, (2, E), 0, N, dtype=jnp.int32)
    params = _init_params(kP, H)

    fwd = jax.jit(context_forward, static_argnums=(5,))
    hV_out, hE_out = fwd(h_V, h_E, edge_idx, batch_id, params, B)
    jax.block_until_ready((hV_out, hE_out))

    hV_ref, hE_ref = _reference(h_V, h_E, edge_idx, batch_id, params, B)
    assert jnp.allclose(hV_out, hV_ref, atol=1e-4, rtol=1e-4)
    assert jnp.allclose(hE_out, hE_ref, atol=1e-4, rtol=1e-4)

    print("KERNEL_OK")
</pallas_src>

<mosaic_0001>
module attributes {stable_mosaic.version = 11 : i64} {
  func.func private @main(%arg0: i32) attributes {dimension_semantics = [#tpu.dimension_semantics<core_parallel>], iteration_bounds = array<i64: 2>, tpu.core_type = #tpu.core_type<sc_scalar_subcore>, window_params = []} {
    return
  }
}

module attributes {stable_mosaic.version = 11 : i64} {
  func.func private @main(%arg0: i32) attributes {dimension_semantics = [#tpu.dimension_semantics<core_parallel>], iteration_bounds = array<i64: 2>, tpu.core_type = #tpu.core_type<sc_scalar_subcore>, window_params = []} {
    return
  }
}

module attributes {stable_mosaic.version = 11 : i64} {
  func.func @_apply_gate_kernel(%arg0: i32, %arg1: memref<32x128xf32, #tpu.memory_space<vmem>>, %arg2: memref<32x1xi32, #tpu.memory_space<vmem>>, %arg3: memref<8x128xf32, #tpu.memory_space<vmem>>, %arg4: memref<32x128xf32, #tpu.memory_space<vmem>>) attributes {dimension_semantics = [#tpu.dimension_semantics<parallel>], iteration_bounds = array<i64: 1>, scalar_prefetch = 0 : i64, scratch_operands = 0 : i64, tpu.core_type = #tpu.core_type<tc>, window_params = [{transform_indices = @transform_0, window_bounds = array<i64: 32, 128>}, {transform_indices = @transform_1, window_bounds = array<i64: 32, 1>}, {pipeline_mode = #tpu.pipeline_mode<synchronous>, transform_indices = @transform_2, window_bounds = array<i64: 8, 128>}, {transform_indices = @transform_3, window_bounds = array<i64: 32, 128>}]} {
    %c0 = arith.constant 0 : index
    %c0_0 = arith.constant 0 : index
    %0 = vector.load %arg2[%c0, %c0_0] : memref<32x1xi32, #tpu.memory_space<vmem>>, vector<32x1xi32>
    %1 = tpu.iota {dimensions = array<i32: 1>} : vector<32x8xi32>
    %2 = vector.broadcast %0 : vector<32x1xi32> to vector<32x8xi32>
    %3 = arith.cmpi eq, %2, %1 : vector<32x8xi32>
    %4 = arith.extui %3 : vector<32x8xi1> to vector<32x8xi32>
    %5 = arith.sitofp %4 : vector<32x8xi32> to vector<32x8xf32>
    %c0_1 = arith.constant 0 : index
    %c0_2 = arith.constant 0 : index
    %6 = vector.load %arg3[%c0_1, %c0_2] : memref<8x128xf32, #tpu.memory_space<vmem>>, vector<8x128xf32>
    %cst = arith.constant dense<0.000000e+00> : vector<32x128xf32>
    %7 = tpu.matmul %5, %6, %cst {dimension_numbers = #tpu.dot_dimension_numbers<[1], [0], [0], [1], [0, 0, 1, 1], [], []>} : vector<32x8xf32>, vector<8x128xf32>, vector<32x128xf32> -> vector<32x128xf32>
    %c0_3 = arith.constant 0 : index
    %c0_4 = arith.constant 0 : index
    %8 = vector.load %arg1[%c0_3, %c0_4] : memref<32x128xf32, #tpu.memory_space<vmem>>, vector<32x128xf32>
    %9 = arith.mulf %8, %7 : vector<32x128xf32>
    %c0_5 = arith.constant 0 : index
    %c0_6 = arith.constant 0 : index
    %10 = vector.load %arg4[%c0_5, %c0_6] : memref<32x128xf32, #tpu.memory_space<vmem>>, vector<32x128xf32>
    tpu.vector_store %arg4[%c0_5, %c0_6], %9 {strides = array<i32>} : memref<32x128xf32, #tpu.memory_space<vmem>>, vector<32x128xf32>,
    return
  }
  func.func @transform_0(%arg0: i32) -> (i32, i32) {
    %c0_i32 = arith.constant 0 : i32
    %c0_i32_0 = arith.constant 0 : i32
    return %arg0, %c0_i32 : i32, i32
  }
  func.func @transform_1(%arg0: i32) -> (i32, i32) {
    %c0_i32 = arith.constant 0 : i32
    %c0_i32_0 = arith.constant 0 : i32
    return %arg0, %c0_i32 : i32, i32
  }
  func.func @transform_2(%arg0: i32) -> (i32, i32) {
    %c0_i32 = arith.constant 0 : i32
    %c0_i32_0 = arith.constant 0 : i32
    %c0_i32_1 = arith.constant 0 : i32
    return %c0_i32, %c0_i32_0 : i32, i32
  }
  func.func @transform_3(%arg0: i32) -> (i32, i32) {
    %c0_i32 = arith.constant 0 : i32
    %c0_i32_0 = arith.constant 0 : i32
    return %arg0, %c0_i32 : i32, i32
  }
}

module attributes {stable_mosaic.version = 11 : i64} {
  func.func @_segment_sum_kernel(%arg0: i32, %arg1: memref<16x128xf32, #tpu.memory_space<vmem>>, %arg2: memref<16x1xi32, #tpu.memory_space<vmem>>, %arg3: memref<8x128xf32, #tpu.memory_space<vmem>>) attributes {dimension_semantics = [#tpu.dimension_semantics<arbitrary>], iteration_bounds = array<i64: 1>, scalar_prefetch = 0 : i64, scratch_operands = 0 : i64, tpu.core_type = #tpu.core_type<tc>, window_params = [{transform_indices = @transform_0, window_bounds = array<i64: 16, 128>}, {transform_indices = @transform_1, window_bounds = array<i64: 16, 1>}, {pipeline_mode = #tpu.pipeline_mode<synchronous>, transform_indices = @transform_2, window_bounds = array<i64: 8, 128>}]} {
    %c0_i32 = arith.constant 0 : i32
    %0 = arith.cmpi eq, %arg0, %c0_i32 : i32
    %1 = arith.extui %0 : i1 to i32
    %c0_i32_0 = arith.constant 0 : i32
    %2 = arith.cmpi ne, %1, %c0_i32_0 : i32
    scf.if %2 {
      %cst_8 = arith.constant 0.000000e+00 : f32
      %14 = vector.broadcast %cst_8 : f32 to vector<8x128xf32>
      %c0_9 = arith.constant 0 : index
      %c0_10 = arith.constant 0 : index
      %15 = vector.load %arg3[%c0_9, %c0_10] : memref<8x128xf32, #tpu.memory_space<vmem>>, vector<8x128xf32>
      tpu.vector_store %arg3[%c0_9, %c0_10], %14 {strides = array<i32>} : memref<8x128xf32, #tpu.memory_space<vmem>>, vector<8x128xf32>,
    } else {
    }
    %c0 = arith.constant 0 : index
    %c0_1 = arith.constant 0 : index
    %3 = vector.load %arg2[%c0, %c0_1] : memref<16x1xi32, #tpu.memory_space<vmem>>, vector<16x1xi32>
    %4 = tpu.iota {dimensions = array<i32: 1>} : vector<16x8xi32>
    %5 = vector.broadcast %3 : vector<16x1xi32> to vector<16x8xi32>
    %6 = arith.cmpi eq, %5, %4 : vector<16x8xi32>
    %7 = arith.extui %6 : vector<16x8xi1> to vector<16x8xi32>
    %8 = arith.sitofp %7 : vector<16x8xi32> to vector<16x8xf32>
    %c0_2 = arith.constant 0 : index
    %c0_3 = arith.constant 0 : index
    %9 = vector.load %arg3[%c0_2, %c0_3] : memref<8x128xf32, #tpu.memory_space<vmem>>, vector<8x128xf32>
    %c0_4 = arith.constant 0 : index
    %c0_5 = arith.constant 0 : index
    %10 = vector.load %arg1[%c0_4, %c0_5] : memref<16x128xf32, #tpu.memory_space<vmem>>, vector<16x128xf32>
    %cst = arith.constant dense<0.000000e+00> : vector<8x128xf32>
    %11 = tpu.matmul %8, %10, %cst {dimension_numbers = #tpu.dot_dimension_numbers<[0], [0], [1], [1], [0, 1, 1, 1], [], []>} : vector<16x8xf32>, vector<16x128xf32>, vector<8x128xf32> -> vector<8x128xf32>
    %12 = arith.addf %9, %11 : vector<8x128xf32>
    %c0_6 = arith.constant 0 : index
    %c0_7 = arith.constant 0 : index
    %13 = vector.load %arg3[%c0_6, %c0_7] : memref<8x128xf32, #tpu.memory_space<vmem>>, vector<8x128xf32>
    tpu.vector_store %arg3[%c0_6, %c0_7], %12 {strides = array<i32>} : memref<8x128xf32, #tpu.memory_space<vmem>>, vector<8x128xf32>,
    return
  }
  func.func @transform_0(%arg0: i32) -> (i32, i32) {
    %c0_i32 = arith.constant 0 : i32
    %c0_i32_0 = arith.constant 0 : i32
    return %arg0, %c0_i32 : i32, i32
  }
  func.func @transform_1(%arg0: i32) -> (i32, i32) {
    %c0_i32 = arith.constant 0 : i32
    %c0_i32_0 = arith.constant 0 : i32
    return %arg0, %c0_i32 : i32, i32
  }
  func.func @transform_2(%arg0: i32) -> (i32, i32) {
    %c0_i32 = arith.constant 0 : i32
    %c0_i32_0 = arith.constant 0 : i32
    %c0_i32_1 = arith.constant 0 : i32
    return %c0_i32, %c0_i32_0 : i32, i32
  }
}

module attributes {stable_mosaic.version = 11 : i64} {
  func.func @_apply_gate_kernel(%arg0: i32, %arg1: memref<16x128xf32, #tpu.memory_space<vmem>>, %arg2: memref<16x1xi32, #tpu.memory_space<vmem>>, %arg3: memref<8x128xf32, #tpu.memory_space<vmem>>, %arg4: memref<16x128xf32, #tpu.memory_space<vmem>>) attributes {dimension_semantics = [#tpu.dimension_semantics<parallel>], iteration_bounds = array<i64: 1>, scalar_prefetch = 0 : i64, scratch_operands = 0 : i64, tpu.core_type = #tpu.core_type<tc>, window_params = [{transform_indices = @transform_0, window_bounds = array<i64: 16, 128>}, {transform_indices = @transform_1, window_bounds = array<i64: 16, 1>}, {pipeline_mode = #tpu.pipeline_mode<synchronous>, transform_indices = @transform_2, window_bounds = array<i64: 8, 128>}, {transform_indices = @transform_3, window_bounds = array<i64: 16, 128>}]} {
    %c0 = arith.constant 0 : index
    %c0_0 = arith.constant 0 : index
    %0 = vector.load %arg2[%c0, %c0_0] : memref<16x1xi32, #tpu.memory_space<vmem>>, vector<16x1xi32>
    %1 = tpu.iota {dimensions = array<i32: 1>} : vector<16x8xi32>
    %2 = vector.broadcast %0 : vector<16x1xi32> to vector<16x8xi32>
    %3 = arith.cmpi eq, %2, %1 : vector<16x8xi32>
    %4 = arith.extui %3 : vector<16x8xi1> to vector<16x8xi32>
    %5 = arith.sitofp %4 : vector<16x8xi32> to vector<16x8xf32>
    %c0_1 = arith.constant 0 : index
    %c0_2 = arith.constant 0 : index
    %6 = vector.load %arg3[%c0_1, %c0_2] : memref<8x128xf32, #tpu.memory_space<vmem>>, vector<8x128xf32>
    %cst = arith.constant dense<0.000000e+00> : vector<16x128xf32>
    %7 = tpu.matmul %5, %6, %cst {dimension_numbers = #tpu.dot_dimension_numbers<[1], [0], [0], [1], [0, 0, 1, 1], [], []>} : vector<16x8xf32>, vector<8x128xf32>, vector<16x128xf32> -> vector<16x128xf32>
    %c0_3 = arith.constant 0 : index
    %c0_4 = arith.constant 0 : index
    %8 = vector.load %arg1[%c0_3, %c0_4] : memref<16x128xf32, #tpu.memory_space<vmem>>, vector<16x128xf32>
    %9 = arith.mulf %8, %7 : vector<16x128xf32>
    %c0_5 = arith.constant 0 : index
    %c0_6 = arith.constant 0 : index
    %10 = vector.load %arg4[%c0_5, %c0_6] : memref<16x128xf32, #tpu.memory_space<vmem>>, vector<16x128xf32>
    tpu.vector_store %arg4[%c0_5, %c0_6], %9 {strides = array<i32>} : memref<16x128xf32, #tpu.memory_space<vmem>>, vector<16x128xf32>,
    return
  }
  func.func @transform_0(%arg0: i32) -> (i32, i32) {
    %c0_i32 = arith.constant 0 : i32
    %c0_i32_0 = arith.constant 0 : i32
    return %arg0, %c0_i32 : i32, i32
  }
  func.func @transform_1(%arg0: i32) -> (i32, i32) {
    %c0_i32 = arith.constant 0 : i32
    %c0_i32_0 = arith.constant 0 : i32
    return %arg0, %c0_i32 : i32, i32
  }
  func.func @transform_2(%arg0: i32) -> (i32, i32) {
    %c0_i32 = arith.constant 0 : i32
    %c0_i32_0 = arith.constant 0 : i32
    %c0_i32_1 = arith.constant 0 : i32
    return %c0_i32, %c0_i32_0 : i32, i32
  }
  func.func @transform_3(%arg0: i32) -> (i32, i32) {
    %c0_i32 = arith.constant 0 : i32
    %c0_i32_0 = arith.constant 0 : i32
    return %arg0, %c0_i32 : i32, i32
  }
}

module attributes {stable_mosaic.version = 11 : i64} {
  func.func @_gates_kernel(%arg0: memref<8x128xf32, #tpu.memory_space<vmem>>, %arg1: memref<8x1xf32, #tpu.memory_space<vmem>>, %arg2: memref<128x128xf32, #tpu.memory_space<vmem>>, %arg3: memref<1x128xf32, #tpu.memory_space<vmem>>, %arg4: memref<128x128xf32, #tpu.memory_space<vmem>>, %arg5: memref<1x128xf32, #tpu.memory_space<vmem>>, %arg6: memref<128x128xf32, #tpu.memory_space<vmem>>, %arg7: memref<1x128xf32, #tpu.memory_space<vmem>>, %arg8: memref<128x128xf32, #tpu.memory_space<vmem>>, %arg9: memref<1x128xf32, #tpu.memory_space<vmem>>, %arg10: memref<128x128xf32, #tpu.memory_space<vmem>>, %arg11: memref<1x128xf32, #tpu.memory_space<vmem>>, %arg12: memref<128x128xf32, #tpu.memory_space<vmem>>, %arg13: memref<1x128xf32, #tpu.memory_space<vmem>>, %arg14: memref<8x128xf32, #tpu.memory_space<vmem>>, %arg15: memref<8x128xf32, #tpu.memory_space<vmem>>) attributes {dimension_semantics = [], scalar_prefetch = 0 : i64, scratch_operands = 0 : i64, tpu.core_type = #tpu.core_type<tc>} {
    %c0 = arith.constant 0 : index
    %c0_0 = arith.constant 0 : index
    %0 = vector.load %arg0[%c0, %c0_0] : memref<8x128xf32, #tpu.memory_space<vmem>>, vector<8x128xf32>
    %c0_1 = arith.constant 0 : index
    %c0_2 = arith.constant 0 : index
    %1 = vector.load %arg1[%c0_1, %c0_2] : memref<8x1xf32, #tpu.memory_space<vmem>>, vector<8x1xf32>
    %2 = vector.broadcast %1 : vector<8x1xf32> to vector<8x128xf32>
    %3 = arith.mulf %0, %2 : vector<8x128xf32>
    %c0_3 = arith.constant 0 : index
    %c0_4 = arith.constant 0 : index
    %4 = vector.load %arg2[%c0_3, %c0_4] : memref<128x128xf32, #tpu.memory_space<vmem>>, vector<128x128xf32>
    %cst = arith.constant dense<0.000000e+00> : vector<8x128xf32>
    %5 = tpu.matmul %3, %4, %cst {dimension_numbers = #tpu.dot_dimension_numbers<[1], [0], [0], [1], [0, 0, 1, 1], [], []>} : vector<8x128xf32>, vector<128x128xf32>, vector<8x128xf32> -> vector<8x128xf32>
    %c0_5 = arith.constant 0 : index
    %c0_6 = arith.constant 0 : index
    %6 = vector.load %arg3[%c0_5, %c0_6] : memref<1x128xf32, #tpu.memory_space<vmem>>, vector<1x128xf32>
    %7 = vector.broadcast %6 : vector<1x128xf32> to vector<8x128xf32>
    %8 = arith.addf %5, %7 : vector<8x128xf32>
    %cst_7 = arith.constant 0.000000e+00 : f32
    %9 = vector.broadcast %cst_7 : f32 to vector<8x128xf32>
    %10 = arith.maximumf %8, %9 : vector<8x128xf32>
    %c0_8 = arith.constant 0 : index
    %c0_9 = arith.constant 0 : index
    %11 = vector.load %arg4[%c0_8, %c0_9] : memref<128x128xf32, #tpu.memory_space<vmem>>, vector<128x128xf32>
    %cst_10 = arith.constant dense<0.000000e+00> : vector<8x128xf32>
    %12 = tpu.matmul %10, %11, %cst_10 {dimension_numbers = #tpu.dot_dimension_numbers<[1], [0], [0], [1], [0, 0, 1, 1], [], []>} : vector<8x128xf32>, vector<128x128xf32>, vector<8x128xf32> -> vector<8x128xf32>
    %c0_11 = arith.constant 0 : index
    %c0_12 = arith.constant 0 : index
    %13 = vector.load %arg5[%c0_11, %c0_12] : memref<1x128xf32, #tpu.memory_space<vmem>>, vector<1x128xf32>
    %14 = vector.broadcast %13 : vector<1x128xf32> to vector<8x128xf32>
    %15 = arith.addf %12, %14 : vector<8x128xf32>
    %cst_13 = arith.constant 0.000000e+00 : f32
    %16 = vector.broadcast %cst_13 : f32 to vector<8x128xf32>
    %17 = arith.maximumf %15, %16 : vector<8x128xf32>
    %c0_14 = arith.constant 0 : index
    %c0_15 = arith.constant 0 : index
    %18 = vector.load %arg6[%c0_14, %c0_15] : memref<128x128xf32, #tpu.memory_space<vmem>>, vector<128x128xf32>
    %cst_16 = arith.constant dense<0.000000e+00> : vector<8x128xf32>
    %19 = tpu.matmul %17, %18, %cst_16 {dimension_numbers = #tpu.dot_dimension_numbers<[1], [0], [0], [1], [0, 0, 1, 1], [], []>} : vector<8x128xf32>, vector<128x128xf32>, vector<8x128xf32> -> vector<8x128xf32>
    %c0_17 = arith.constant 0 : index
    %c0_18 = arith.constant 0 : index
    %20 = vector.load %arg7[%c0_17, %c0_18] : memref<1x128xf32, #tpu.memory_space<vmem>>, vector<1x128xf32>
    %21 = vector.broadcast %20 : vector<1x128xf32> to vector<8x128xf32>
    %22 = arith.addf %19, %21 : vector<8x128xf32>
    %23 = arith.negf %22 : vector<8x128xf32>
    %24 = math.exp %23 : vector<8x128xf32>
    %cst_19 = arith.constant 1.000000e+00 : f32
    %25 = vector.broadcast %cst_19 : f32 to vector<8x128xf32>
    %26 = arith.addf %25, %24 : vector<8x128xf32>
    %27 = arith.divf %25, %26 : vector<8x128xf32>
    %28 = arith.mulf %3, %27 : vector<8x128xf32>
    %c0_20 = arith.constant 0 : index
    %c0_21 = arith.constant 0 : index
    %29 = vector.load %arg8[%c0_20, %c0_21] : memref<128x128xf32, #tpu.memory_space<vmem>>, vector<128x128xf32>
    %cst_22 = arith.constant dense<0.000000e+00> : vector<8x128xf32>
    %30 = tpu.matmul %28, %29, %cst_22 {dimension_numbers = #tpu.dot_dimension_numbers<[1], [0], [0], [1], [0, 0, 1, 1], [], []>} : vector<8x128xf32>, vector<128x128xf32>, vector<8x128xf32> -> vector<8x128xf32>
    %c0_23 = arith.constant 0 : index
    %c0_24 = arith.constant 0 : index
    %31 = vector.load %arg9[%c0_23, %c0_24] : memref<1x128xf32, #tpu.memory_space<vmem>>, vector<1x128xf32>
    %32 = vector.broadcast %31 : vector<1x128xf32> to vector<8x128xf32>
    %33 = arith.addf %30, %32 : vector<8x128xf32>
    %cst_25 = arith.constant 0.000000e+00 : f32
    %34 = vector.broadcast %cst_25 : f32 to vector<8x128xf32>
    %35 = arith.maximumf %33, %34 : vector<8x128xf32>
    %c0_26 = arith.constant 0 : index
    %c0_27 = arith.constant 0 : index
    %36 = vector.load %arg10[%c0_26, %c0_27] : memref<128x128xf32, #tpu.memory_space<vmem>>, vector<128x128xf32>
    %cst_28 = arith.constant dense<0.000000e+00> : vector<8x128xf32>
    %37 = tpu.matmul %35, %36, %cst_28 {dimension_numbers = #tpu.dot_dimension_numbers<[1], [0], [0], [1], [0, 0, 1, 1], [], []>} : vector<8x128xf32>, vector<128x128xf32>, vector<8x128xf32> -> vector<8x128xf32>
    %c0_29 = arith.constant 0 : index
    %c0_30 = arith.constant 0 : index
    %38 = vector.load %arg11[%c0_29, %c0_30] : memref<1x128xf32, #tpu.memory_space<vmem>>, vector<1x128xf32>
    %39 = vector.broadcast %38 : vector<1x128xf32> to vector<8x128xf32>
    %40 = arith.addf %37, %39 : vector<8x128xf32>
    %cst_31 = arith.constant 0.000000e+00 : f32
    %41 = vector.broadcast %cst_31 : f32 to vector<8x128xf32>
    %42 = arith.maximumf %40, %41 : vector<8x128xf32>
    %c0_32 = arith.constant 0 : index
    %c0_33 = arith.constant 0 : index
    %43 = vector.load %arg12[%c0_32, %c0_33] : memref<128x128xf32, #tpu.memory_space<vmem>>, vector<128x128xf32>
    %cst_34 = arith.constant dense<0.000000e+00> : vector<8x128xf32>
    %44 = tpu.matmul %42, %43, %cst_34 {dimension_numbers = #tpu.dot_dimension_numbers<[1], [0], [0], [1], [0, 0, 1, 1], [], []>} : vector<8x128xf32>, vector<128x128xf32>, vector<8x128xf32> -> vector<8x128xf32>
    %c0_35 = arith.constant 0 : index
    %c0_36 = arith.constant 0 : index
    %45 = vector.load %arg13[%c0_35, %c0_36] : memref<1x128xf32, #tpu.memory_space<vmem>>, vector<1x128xf32>
    %46 = vector.broadcast %45 : vector<1x128xf32> to vector<8x128xf32>
    %47 = arith.addf %44, %46 : vector<8x128xf32>
    %48 = arith.negf %47 : vector<8x128xf32>
    %49 = math.exp %48 : vector<8x128xf32>
    %cst_37 = arith.constant 1.000000e+00 : f32
    %50 = vector.broadcast %cst_37 : f32 to vector<8x128xf32>
    %51 = arith.addf %50, %49 : vector<8x128xf32>
    %52 = arith.divf %50, %51 : vector<8x128xf32>
    %c0_38 = arith.constant 0 : index
    %c0_39 = arith.constant 0 : index
    %53 = vector.load %arg14[%c0_38, %c0_39] : memref<8x128xf32, #tpu.memory_space<vmem>>, vector<8x128xf32>
    tpu.vector_store %arg14[%c0_38, %c0_39], %27 {strides = array<i32>} : memref<8x128xf32, #tpu.memory_space<vmem>>, vector<8x128xf32>,
    %c0_40 = arith.constant 0 : index
    %c0_41 = arith.constant 0 : index
    %54 = vector.load %arg15[%c0_40, %c0_41] : memref<8x128xf32, #tpu.memory_space<vmem>>, vector<8x128xf32>
    tpu.vector_store %arg15[%c0_40, %c0_41], %52 {strides = array<i32>} : memref<8x128xf32, #tpu.memory_space<vmem>>, vector<8x128xf32>,
    return
  }
}

</mosaic_0001>

<bundles_post_ra>
// kernel: context_forward.7
= control target key start
LH: loop header
LB: loop body
LE: loop exit
PB: predicated region body
PF: predicated region fallthrough
CT: control target
= control target key end

     0   :  { %v186_v0 = vmov 0   ;;  %v18_v6 = vlaneseq  ;;  %vm45_vm0 = vcmask 64512   ;;  %v187_v10 = vmov 0.0   ;;  %s247_s1 = inlined_call_operand.vmem [shape: s32[32,1], index: 1, kind: input, shape index: {}]   ;;  %s248_s2 = inlined_call_operand.vmem [shape: f32[8,128], index: 2, kind: input, shape index: {}]   ;;  %s249_s0 = inlined_call_operand.vmem [shape: f32[32,128], index: 0, kind: input, shape index: {}, may-alias: {0,3}]   ;;  %s250_s3 = inlined_call_operand.vmem [shape: f32[32,128], index: 3, kind: output, shape index: {}, may-alias: {0,3}]  }
   0x1   :  { %185 = vset.pattern.permute.xlu1 %v186_v0  ;;  %184 = vset.pattern.permute.xlu0 %v186_v0  ;;  %v15_v1 = vld [vmem:[%s247_s1 + $0x8] sm:$0xff]  ;;  %v14_v2 = vld [vmem:[%s247_s1] sm:$0xff]  ;;  %v17_v4 = vld [vmem:[%s247_s1 + $0x18] sm:$0xff] }
   0x2   :  { %24 = vperm.xlu1 %185, %v15_v1   ;;  %21 = vperm.xlu0 %184, %v14_v2   ;;  %v44_v3 = vld [vmem:[%s248_s2] sm:$0xff]  ;;  %v16_v5 = vld [vmem:[%s247_s1 + $0x10] sm:$0xff]  ;;  %v19_v7 = vand.u32 127, %v18_v6  ;;  %v144_v17 = vld [vmem:[%s249_s0 + $0x8] sm:$0xff] }
   0x3   :  { %172 = vmatprep.subr.mxu0 %v44_v3  ;;  %180 = vmatprep.subr.mxu1 %v44_v3  ;;  %v143_v18 = vld [vmem:[%s249_s0] sm:$0xff]  ;;  %v146_v23 = vld [vmem:[%s249_s0 + $0x18] sm:$0xff] }
   0x4   :  { %173 = vmatpush3.msra.mxu0 %v44_v3  ;;  %181 = vmatpush3.msra.mxu1 %v44_v3 }
   0x6   :  { %30 = vperm.xlu1 %185, %v17_v4   ;;  %27 = vperm.xlu0 %184, %v16_v5  }
  0x81   :  { %v25_v8 = vpop.permute.xlu1 %24  ;;  %v22_v9 = vpop.permute.xlu0 %21 }
  0x82   :  { %vm33_vm1 = vcmp.eq.s32.totalorder %v25_v8, %v19_v7  ;;  %vm32_vm2 = vcmp.eq.s32.totalorder %v22_v9, %v19_v7 }
  0x83   :  { %v160_v11 = vsel %vm33_vm1, 1.0, %v187_v10  ;;  %v159_v12 = vsel %vm32_vm2, 1.0, %v187_v10 }
  0x84   :  { %174 = vmatprep.mubr.msk.f32.mxu0 %vm45_vm0, %v159_v12 }
  0x85   :  { %v31_v13 = vpop.permute.xlu1 %30  ;;  %175 = vmatmul.mubr.msk.f32.vlgmr.msra.gmra.mrb[0].mxu0 %vm45_vm0, %v160_v11  ;;  %v28_v14 = vpop.permute.xlu0 %27 }
  0x86   :  { %vm35_vm3 = vcmp.eq.s32.totalorder %v31_v13, %v19_v7  ;;  %vm34_vm4 = vcmp.eq.s32.totalorder %v28_v14, %v19_v7 }
  0x87   :  { %v162_v15 = vsel %vm35_vm3, 1.0, %v187_v10  ;;  %v161_v16 = vsel %vm34_vm4, 1.0, %v187_v10 }
  0x88   :  { %177 = vmatprep.mubr.msk.f32.mxu1 %vm45_vm0, %v161_v16 }
  0x89   :  { %178 = vmatmul.mubr.msk.f32.vlgmr.msra.gmra.mrb[0].mxu1 %vm45_vm0, %v162_v15 }
 0x158   :  { %v176_v19 = vpop.f32.mrb[0].mxu0 }
 0x159   :  { %v148_v20 = vmul.f32 %v176_v19, %v144_v17  ;;  %v124_v21 = vpop.f32.mrb[1].mxu0 }
 0x15a   :  { %v147_v22 = vmul.f32 %v143_v18, %v124_v21 }
 0x15b   :  { %152 = vst [vmem:[%s250_s3 + $0x8] sm:$0xff] %v148_v20 }
 0x15c   :  { %v179_v25 = vpop.f32.mrb[0].mxu1 }
 0x15d   :  { %v150_v26 = vmul.f32 %v179_v25, %v146_v23  ;;  %v134_v27 = vpop.f32.mrb[1].mxu1 }
 0x162   :  { %v145_v24 = vld [vmem:[%s249_s0 + $0x10] sm:$0xff] }
 0x163   :  { %151 = vst [vmem:[%s250_s3] sm:$0xff] %v147_v22  ;;  %v149_v28 = vmul.f32 %v145_v24, %v134_v27  ;;  %154 = vst [vmem:[%s250_s3 + $0x18] sm:$0xff] %v150_v26 }
 0x165   :  { %153 = vst [vmem:[%s250_s3 + $0x10] sm:$0xff] %v149_v28 }

// kernel: context_forward.4
= control target key start
LH: loop header
LB: loop body
LE: loop exit
PB: predicated region body
PF: predicated region fallthrough
CT: control target
= control target key end

     0   :  { %v168_v0 = vmov 0   ;;  %v169_v3 = vmov 0.0|0.0   ;;  %vm170_vm0 = vmmov 0   ;;  %v171_v6 = vmov 0.0   ;;  %s202_s1 = inlined_call_operand.vmem [shape: s32[16,1], index: 1, kind: input, shape index: {}]   ;;  %s203_s0 = inlined_call_operand.vmem [shape: f32[16,128], index: 0, kind: input, shape index: {}]   ;;  %s204_s2 = inlined_call_operand.vmem [shape: f32[8,128], index: 2, kind: output, shape index: {}]  }
   0x1   :  { %167 = vset.pattern.permute.xlu0 %v168_v0  ;;  %v16_v1 = vld [vmem:[%s202_s1] sm:$0xff]  ;;  %v17_v2 = vld [vmem:[%s202_s1 + $0x8] sm:$0xff]  ;;  %160 = vmatprep.subr.bf16.mxu0 %v169_v3  ;;  %v18_v8 = vlaneseq  ;;  %vm67_vm3 = vcmask 130048  }
   0x2   :  { %21 = vperm.xlu0 %167, %v16_v1   ;;  %v33_v4 = vld [vmem:[%s203_s0] sm:$0xff]  ;;  %v34_v5 = vld [vmem:[%s203_s0 + $0x8] sm:$0xff]  ;;  %157 = vmatprep.mubr.msk.f32.mxu0 %vm170_vm0, %v171_v6 }
   0x3   :  { %v161_v7 = vpack.c.bf16 %v34_v5, %v33_v4  ;;  %v19_v9 = vand.u32 127, %v18_v8 }
   0x5   :  { %162 = vmatpush3.bf16.msra.mxu0 %v161_v7 }
   0x6   :  { %24 = vperm.xlu0 %167, %v17_v2  }
  0x81   :  { %v22_v10 = vpop.permute.xlu0 %21 }
  0x82   :  { %vm26_vm1 = vcmp.eq.s32.totalorder %v22_v10, %v19_v9 }
  0x83   :  { %v147_v11 = vsel %vm26_vm1, 1.0, %v171_v6 }
  0x84   :  { %35 = vxpose.xlu1.b32.start [1/2] (short) (narrow) %v147_v11, 8 }
  0x85   :  { %v25_v12 = vpop.permute.xlu0 %24 }
  0x86   :  { %vm27_vm2 = vcmp.eq.s32.totalorder %v25_v12, %v19_v9 }
  0x87   :  { %v148_v13 = vsel %vm27_vm2, 1.0, %v171_v6 }
  0x88   :  { %36 = vxpose.xlu1.b32.end [2/2] (short) (narrow) %v148_v13, 8 }
 0x104   :  { %v51_v14 = vpop.trf.xlu1 }
 0x105   :  { %158 = vmatmul.mubr.msk.f32.vlgmr.msra.gmra.mrb[0].mxu0 %vm67_vm3, %v51_v14 }
 0x1d8   :  { %v137_v15 = vpop.f32.mrb[0].mxu0 }
 0x1d9   :  { %v159_v16 = vpop.f32.mrb[1].mxu0  ;;  %142 = vst [vmem:[%s204_s2] sm:$0xff] %v137_v15 }

// kernel: context_forward.6
= control target key start
LH: loop header
LB: loop body
LE: loop exit
PB: predicated region body
PF: predicated region fallthrough
CT: control target
= control target key end

     0   :  { %v138_v0 = vmov 0   ;;  %v16_v4 = vlaneseq  ;;  %vm31_vm0 = vcmask 64512   ;;  %v139_v7 = vmov 0.0   ;;  %s181_s1 = inlined_call_operand.vmem [shape: s32[16,1], index: 1, kind: input, shape index: {}]   ;;  %s182_s2 = inlined_call_operand.vmem [shape: f32[8,128], index: 2, kind: input, shape index: {}]   ;;  %s183_s0 = inlined_call_operand.vmem [shape: f32[16,128], index: 0, kind: input, shape index: {}, may-alias: {0,3}]   ;;  %s184_s3 = inlined_call_operand.vmem [shape: f32[16,128], index: 3, kind: output, shape index: {}, may-alias: {0,3}]  }
   0x1   :  { %137 = vset.pattern.permute.xlu0 %v138_v0  ;;  %v14_v1 = vld [vmem:[%s181_s1] sm:$0xff]  ;;  %v15_v2 = vld [vmem:[%s181_s1 + $0x8] sm:$0xff] }
   0x2   :  { %19 = vperm.xlu0 %137, %v14_v1   ;;  %v30_v3 = vld [vmem:[%s182_s2] sm:$0xff]  ;;  %v17_v5 = vand.u32 127, %v16_v4  ;;  %v114_v11 = vld [vmem:[%s183_s0 + $0x8] sm:$0xff] }
   0x3   :  { %130 = vmatprep.subr.mxu0 %v30_v3  ;;  %v113_v12 = vld [vmem:[%s183_s0] sm:$0xff] }
   0x4   :  { %131 = vmatpush3.msra.mxu0 %v30_v3 }
   0x6   :  { %22 = vperm.xlu0 %137, %v15_v2  }
  0x81   :  { %v20_v6 = vpop.permute.xlu0 %19 }
  0x82   :  { %vm24_vm1 = vcmp.eq.s32.totalorder %v20_v6, %v17_v5 }
  0x83   :  { %v123_v8 = vsel %vm24_vm1, 1.0, %v139_v7 }
  0x84   :  { %132 = vmatprep.mubr.msk.f32.mxu0 %vm31_vm0, %v123_v8 }
  0x85   :  { %v23_v9 = vpop.permute.xlu0 %22 }
  0x86   :  { %vm25_vm2 = vcmp.eq.s32.totalorder %v23_v9, %v17_v5 }
  0x87   :  { %v124_v10 = vsel %vm25_vm2, 1.0, %v139_v7 }
  0x88   :  { %133 = vmatmul.mubr.msk.f32.vlgmr.msra.gmra.mrb[0].mxu0 %vm31_vm0, %v124_v10 }
 0x15b   :  { %v134_v13 = vpop.f32.mrb[0].mxu0 }
 0x15c   :  { %v116_v14 = vmul.f32 %v134_v13, %v114_v11  ;;  %v104_v15 = vpop.f32.mrb[1].mxu0 }
 0x15d   :  { %v115_v16 = vmul.f32 %v113_v12, %v104_v15 }
 0x15e   :  { %118 = vst [vmem:[%s184_s3 + $0x8] sm:$0xff] %v116_v14 }
 0x15f   :  { %117 = vst [vmem:[%s184_s3] sm:$0xff] %v115_v16 }

// kernel: context_forward.5
= control target key start
LH: loop header
LB: loop body
LE: loop exit
PB: predicated region body
PF: predicated region fallthrough
CT: control target
= control target key end

     0   :  { %v1119_v0 = vmov 0   ;;  %v1120_v2 = vmov 0.0|0.0   ;;  %vm1121_vm0 = vmmov 0   ;;  %v1122_v8 = vmov 0.0   ;;  %s1585_s1 = inlined_call_operand.vmem [shape: f32[8,1], index: 1, kind: input, shape index: {}]   ;;  %s1586_s2 = inlined_call_operand.vmem [shape: f32[128,128], index: 2, kind: input, shape index: {}]   ;;  %s1587_s4 = inlined_call_operand.vmem [shape: f32[128,128], index: 4, kind: input, shape index: {}]   ;;  %s1588_s0 = inlined_call_operand.vmem [shape: f32[8,128], index: 0, kind: input, shape index: {}]   ;;  %s1589_s6 = inlined_call_operand.vmem [shape: f32[128,128], index: 6, kind: input, shape index: {}]   ;;  %s1590_s3 = inlined_call_operand.vmem [shape: f32[1,128], index: 3, kind: input, shape index: {}]   ;;  %s1591_s5 = inlined_call_operand.vmem [shape: f32[1,128], index: 5, kind: input, shape index: {}]   ;;  %s1592_s8 = inlined_call_operand.vmem [shape: f32[128,128], index: 8, kind: input, shape index: {}]   ;;  %s1593_s10 = inlined_call_operand.vmem [shape: f32[128,128], index: 10, kind: input, shape index: {}]   ;;  %s1594_s7 = inlined_call_operand.vmem [shape: f32[1,128], index: 7, kind: input, shape index: {}]   ;;  %s1595_s14 = inlined_call_operand.vmem [shape: f32[8,128], index: 14, kind: output, shape index: {0}]   ;;  %s1596_s12 = inlined_call_operand.vmem [shape: f32[128,128], index: 12, kind: input, shape index: {}]   ;;  %s1597_s9 = inlined_call_operand.vmem [shape: f32[1,128], index: 9, kind: input, shape index: {}]   ;;  %s1598_s11 = inlined_call_operand.vmem [shape: f32[1,128], index: 11, kind: input, shape index: {}]   ;;  %s1599_s13 = inlined_call_operand.vmem [shape: f32[1,128], index: 13, kind: input, shape index: {}]   ;;  %s1600_s15 = inlined_call_operand.vmem [shape: f32[8,128], index: 15, kind: output, shape index: {1}]  }
   0x1   :  { %1110 = vset.pattern.permute.xlu0 %v1119_v0  ;;  %v50_v1 = vld [vmem:[%s1585_s1] sm:$0xff]  ;;  %962 = vmatprep.subr.bf16.mxu0 %v1120_v2  ;;  %v58_v4 = vld [vmem:[%s1586_s2 + $0x8] sm:$0xff]  ;;  %v59_v6 = vld [vmem:[%s1586_s2 + $0x10] sm:$0xff] }
   0x2   :  { %v57_v3 = vld [vmem:[%s1586_s2] sm:$0xff]  ;;  %53 = vperm.xlu0 %1110, %v50_v1   ;;  %v60_v7 = vld [vmem:[%s1586_s2 + $0x18] sm:$0xff]  ;;  %986 = vmatprep.subr.bf16.mxu1 %v1120_v2  ;;  %v62_v11 = vld [vmem:[%s1586_s2 + $0x28] sm:$0xff] }
   0x3   :  { %v963_v5 = vpack.c.bf16 %v58_v4, %v57_v3  ;;  %784 = vmatprep.mubr.msk.f32.mxu0 %vm1121_vm0, %v1122_v8  ;;  %819 = vmatprep.mubr.msk.f32.mxu1 %vm1121_vm0, %v1122_v8  ;;  %v966_v9 = vpack.c.bf16 %v60_v7, %v59_v6  ;;  %v61_v10 = vld [vmem:[%s1586_s2 + $0x20] sm:$0xff]  ;;  %v152_v13 = vld [vmem:[%s1587_s4 + $0x8] sm:$0xff]  ;;  %v153_v14 = vld [vmem:[%s1587_s4 + $0x10] sm:$0xff] }
   0x4   :  { %v151_v12 = vld [vmem:[%s1587_s4] sm:$0xff]  ;;  %v969_v15 = vpack.c.bf16 %v62_v11, %v61_v10  ;;  %v154_v17 = vld [vmem:[%s1587_s4 + $0x18] sm:$0xff]  ;;  %v63_v18 = vld [vmem:[%s1586_s2 + $0x30] sm:$0xff] }
   0x5   :  { %964 = vmatpush3.bf16.msra.mxu0 %v963_v5  ;;  %v987_v16 = vpack.c.bf16 %v152_v13, %v151_v12  ;;  %v64_v19 = vld [vmem:[%s1586_s2 + $0x38] sm:$0xff]  ;;  %v990_v20 = vpack.c.bf16 %v154_v17, %v153_v14  ;;  %v155_v21 = vld [vmem:[%s1587_s4 + $0x20] sm:$0xff]  ;;  %v156_v22 = vld [vmem:[%s1587_s4 + $0x28] sm:$0xff] }
   0x6   :  { %965 = vmatprep.subr.bf16.mxu0 %v1120_v2  ;;  %v972_v23 = vpack.c.bf16 %v64_v19, %v63_v18  ;;  %v65_v24 = vld [vmem:[%s1586_s2 + $0x40] sm:$0xff]  ;;  %v66_v25 = vld [vmem:[%s1586_s2 + $0x48] sm:$0xff]  ;;  %v993_v26 = vpack.c.bf16 %v156_v22, %v155_v21  ;;  %v157_v27 = vld [vmem:[%s1587_s4 + $0x30] sm:$0xff] }
   0x7   :  { %988 = vmatpush3.bf16.msra.mxu1 %v987_v16  ;;  %v158_v28 = vld [vmem:[%s1587_s4 + $0x38] sm:$0xff]  ;;  %v975_v29 = vpack.c.bf16 %v66_v25, %v65_v24  ;;  %v67_v30 = vld [vmem:[%s1586_s2 + $0x50] sm:$0xff]  ;;  %v159_v33 = vld [vmem:[%s1587_s4 + $0x40] sm:$0xff] }
   0x8   :  { %989 = vmatprep.subr.bf16.mxu1 %v1120_v2  ;;  %v68_v31 = vld [vmem:[%s1586_s2 + $0x58] sm:$0xff]  ;;  %v996_v32 = vpack.c.bf16 %v158_v28, %v157_v27  ;;  %v160_v34 = vld [vmem:[%s1587_s4 + $0x48] sm:$0xff]  ;;  %v69_v36 = vld [vmem:[%s1586_s2 + $0x60] sm:$0xff] }
   0x9   :  { %967 = vmatpush3.bf16.msra.mxu0 %v966_v9  ;;  %v978_v35 = vpack.c.bf16 %v68_v31, %v67_v30  ;;  %v70_v37 = vld [vmem:[%s1586_s2 + $0x68] sm:$0xff]  ;;  %v999_v38 = vpack.c.bf16 %v160_v34, %v159_v33  ;;  %v161_v39 = vld [vmem:[%s1587_s4 + $0x50] sm:$0xff]  ;;  %v162_v40 = vld [vmem:[%s1587_s4 + $0x58] sm:$0xff] }
   0xa   :  { %968 = vmatprep.subr.bf16.mxu0 %v1120_v2  ;;  %v981_v41 = vpack.c.bf16 %v70_v37, %v69_v36  ;;  %v71_v42 = vld [vmem:[%s1586_s2 + $0x70] sm:$0xff]  ;;  %v72_v43 = vld [vmem:[%s1586_s2 + $0x78] sm:$0xff]  ;;  %v1002_v44 = vpack.c.bf16 %v162_v40, %v161_v39  ;;  %v163_v45 = vld [vmem:[%s1587_s4 + $0x60] sm:$0xff] }
   0xb   :  { %991 = vmatpush3.bf16.msra.mxu1 %v990_v20  ;;  %v164_v46 = vld [vmem:[%s1587_s4 + $0x68] sm:$0xff]  ;;  %v984_v47 = vpack.c.bf16 %v72_v43, %v71_v42  ;;  %v49_v49 = vld [vmem:[%s1588_s0] sm:$0xff]  ;;  %v165_v52 = vld [vmem:[%s1587_s4 + $0x70] sm:$0xff] }
   0xc   :  { %992 = vmatprep.subr.bf16.mxu1 %v1120_v2  ;;  %v1005_v48 = vpack.c.bf16 %v164_v46, %v163_v45  ;;  %v166_v53 = vld [vmem:[%s1587_s4 + $0x78] sm:$0xff]  ;;  %v245_v55 = vld [vmem:[%s1589_s6] sm:$0xff]  ;;  %v246_v56 = vld [vmem:[%s1589_s6 + $0x8] sm:$0xff] }
   0xd   :  { %970 = vmatpush3.bf16.msra.mxu0 %v969_v15  ;;  %v1008_v54 = vpack.c.bf16 %v166_v53, %v165_v52  ;;  %v247_v57 = vld [vmem:[%s1589_s6 + $0x10] sm:$0xff]  ;;  %v1011_v58 = vpack.c.bf16 %v246_v56, %v245_v55  ;;  %v248_v59 = vld [vmem:[%s1589_s6 + $0x18] sm:$0xff]  ;;  %v249_v61 = vld [vmem:[%s1589_s6 + $0x20] sm:$0xff] }
   0xe   :  { %971 = vmatprep.subr.bf16.mxu0 %v1120_v2  ;;  %v1014_v60 = vpack.c.bf16 %v248_v59, %v247_v57  ;;  %v250_v62 = vld [vmem:[%s1589_s6 + $0x28] sm:$0xff]  ;;  %v251_v0 = vld [vmem:[%s1589_s6 + $0x30] sm:$0xff]  ;;  %v252_v1 = vld [vmem:[%s1589_s6 + $0x38] sm:$0xff] }
   0xf   :  { %994 = vmatpush3.bf16.msra.mxu1 %v993_v26  ;;  %v1017_v63 = vpack.c.bf16 %v250_v62, %v249_v61  ;;  %v1020_v3 = vpack.c.bf16 %v252_v1, %v251_v0  ;;  %v253_v4 = vld [vmem:[%s1589_s6 + $0x40] sm:$0xff]  ;;  %v254_v5 = vld [vmem:[%s1589_s6 + $0x48] sm:$0xff]  ;;  %v255_v7 = vld [vmem:[%s1589_s6 + $0x50] sm:$0xff] }
  0x10   :  { %995 = vmatprep.subr.bf16.mxu1 %v1120_v2  ;;  %v1023_v6 = vpack.c.bf16 %v254_v5, %v253_v4  ;;  %v256_v9 = vld [vmem:[%s1589_s6 + $0x58] sm:$0xff]  ;;  %v257_v11 = vld [vmem:[%s1589_s6 + $0x60] sm:$0xff]  ;;  %v258_v12 = vld [vmem:[%s1589_s6 + $0x68] sm:$0xff] }
  0x11   :  { %973 = vmatpush3.bf16.msra.mxu0 %v972_v23  ;;  %v1026_v10 = vpack.c.bf16 %v256_v9, %v255_v7  ;;  %v1029_v13 = vpack.c.bf16 %v258_v12, %v257_v11  ;;  %v642_v14 = vld [vmem:[%s1590_s3] ss:$0 sm:$0xff]  ;;  %v259_v19 = vld [vmem:[%s1589_s6 + $0x70] sm:$0xff]  ;;  %v260_v20 = vld [vmem:[%s1589_s6 + $0x78] sm:$0xff] }
  0x12   :  { %974 = vmatprep.subr.bf16.mxu0 %v1120_v2  ;;  %v1032_v21 = vpack.c.bf16 %v260_v20, %v259_v19  ;;  %v643_v22 = vld [vmem:[%s1591_s5] ss:$0 sm:$0xff]  ;;  %v346_v28 = vld [vmem:[%s1592_s8 + $0x8] sm:$0xff]  ;;  %v347_v30 = vld [vmem:[%s1592_s8 + $0x10] sm:$0xff] }
  0x13   :  { %997 = vmatpush3.bf16.msra.mxu1 %v996_v32  ;;  %v345_v27 = vld [vmem:[%s1592_s8] sm:$0xff]  ;;  %v348_v31 = vld [vmem:[%s1592_s8 + $0x18] sm:$0xff]  ;;  %v350_v34 = vld [vmem:[%s1592_s8 + $0x28] sm:$0xff] }
  0x14   :  { %998 = vmatprep.subr.bf16.mxu1 %v1120_v2  ;;  %v1038_v32 = vpack.c.bf16 %v348_v31, %v347_v30  ;;  %v349_v33 = vld [vmem:[%s1592_s8 + $0x20] sm:$0xff]  ;;  %v351_v36 = vld [vmem:[%s1592_s8 + $0x30] sm:$0xff]  ;;  %v352_v37 = vld [vmem:[%s1592_s8 + $0x38] sm:$0xff] }
  0x15   :  { %976 = vmatpush3.bf16.msra.mxu0 %v975_v29  ;;  %v1035_v29 = vpack.c.bf16 %v346_v28, %v345_v27  ;;  %v353_v39 = vld [vmem:[%s1592_s8 + $0x40] sm:$0xff]  ;;  %v354_v40 = vld [vmem:[%s1592_s8 + $0x48] sm:$0xff]  ;;  %v355_v42 = vld [vmem:[%s1592_s8 + $0x50] sm:$0xff] }
  0x16   :  { %977 = vmatprep.subr.bf16.mxu0 %v1120_v2  ;;  %v356_v43 = vld [vmem:[%s1592_s8 + $0x58] sm:$0xff]  ;;  %v357_v45 = vld [vmem:[%s1592_s8 + $0x60] sm:$0xff]  ;;  %v358_v46 = vld [vmem:[%s1592_s8 + $0x68] sm:$0xff] }
  0x17   :  { %1000 = vmatpush3.bf16.msra.mxu1 %v999_v38  ;;  %v1044_v38 = vpack.c.bf16 %v352_v37, %v351_v36  ;;  %v439_v52 = vld [vmem:[%s1593_s10] sm:$0xff]  ;;  %v440_v53 = vld [vmem:[%s1593_s10 + $0x8] sm:$0xff]  ;;  %v442_v56 = vld [vmem:[%s1593_s10 + $0x18] sm:$0xff] }
  0x18   :  { %1001 = vmatprep.subr.bf16.mxu1 %v1120_v2  ;;  %v1059_v55 = vpack.c.bf16 %v440_v53, %v439_v52  ;;  %v444_v59 = vld [vmem:[%s1593_s10 + $0x28] sm:$0xff]  ;;  %v445_v61 = vld [vmem:[%s1593_s10 + $0x30] sm:$0xff]  ;;  %v446_v62 = vld [vmem:[%s1593_s10 + $0x38] sm:$0xff] }
  0x19   :  { %979 = vmatpush3.bf16.msra.mxu0 %v978_v35  ;;  %v1041_v35 = vpack.c.bf16 %v350_v34, %v349_v33  ;;  %v447_v0 = vld [vmem:[%s1593_s10 + $0x40] sm:$0xff]  ;;  %v448_v1 = vld [vmem:[%s1593_s10 + $0x48] sm:$0xff]  ;;  %v449_v4 = vld [vmem:[%s1593_s10 + $0x50] sm:$0xff] }
  0x1a   :  { %980 = vmatprep.subr.bf16.mxu0 %v1120_v2  ;;  %v450_v5 = vld [vmem:[%s1593_s10 + $0x58] sm:$0xff]  ;;  %v451_v7 = vld [vmem:[%s1593_s10 + $0x60] sm:$0xff]  ;;  %v452_v9 = vld [vmem:[%s1593_s10 + $0x68] sm:$0xff] }
  0x1b   :  { %1003 = vmatpush3.bf16.msra.mxu1 %v1002_v44  ;;  %v1050_v44 = vpack.c.bf16 %v356_v43, %v355_v42  ;;  %v644_v11 = vld [vmem:[%s1594_s7] ss:$0 sm:$0xff]  ;;  %v453_v20 = vld [vmem:[%s1593_s10 + $0x70] sm:$0xff]  ;;  %v538_v28 = vld [vmem:[%s1596_s12 + $0x28] sm:$0xff] }
  0x1c   :  { %1004 = vmatprep.subr.bf16.mxu1 %v1120_v2  ;;  %v537_v27 = vld [vmem:[%s1596_s12 + $0x20] sm:$0xff]  ;;  %v539_v30 = vld [vmem:[%s1596_s12 + $0x30] sm:$0xff]  ;;  %v540_v31 = vld [vmem:[%s1596_s12 + $0x38] sm:$0xff] }
  0x1d   :  { %982 = vmatpush3.bf16.msra.mxu0 %v981_v41  ;;  %v1047_v41 = vpack.c.bf16 %v354_v40, %v353_v39  ;;  %v541_v33 = vld [vmem:[%s1596_s12 + $0x40] sm:$0xff]  ;;  %v542_v34 = vld [vmem:[%s1596_s12 + $0x48] sm:$0xff]  ;;  %v543_v36 = vld [vmem:[%s1596_s12 + $0x50] sm:$0xff] }
  0x1e   :  { %983 = vmatprep.subr.bf16.mxu0 %v1120_v2  ;;  %v544_v37 = vld [vmem:[%s1596_s12 + $0x58] sm:$0xff]  ;;  %v545_v39 = vld [vmem:[%s1596_s12 + $0x60] sm:$0xff]  ;;  %v546_v40 = vld [vmem:[%s1596_s12 + $0x68] sm:$0xff] }
  0x1f   :  { %1006 = vmatpush3.bf16.msra.mxu1 %v1005_v48  ;;  %v359_v48 = vld [vmem:[%s1592_s8 + $0x70] sm:$0xff]  ;;  %v646_v42 = vld [vmem:[%s1597_s9] ss:$0 sm:$0xff] }
  0x20   :  { %1007 = vmatprep.subr.bf16.mxu1 %v1120_v2 }
  0x21   :  { %985 = vmatpush3.bf16.msra.mxu0 %v984_v47  ;;  %v1053_v47 = vpack.c.bf16 %v358_v46, %v357_v45 }
  0x22   :  { %1010 = vmatprep.subr.bf16.mxu0 %v1120_v2 }
  0x23   :  { %1009 = vmatpush3.bf16.msra.mxu1 %v1008_v54  ;;  %v441_v54 = vld [vmem:[%s1593_s10 + $0x10] sm:$0xff] }
  0x24   :  { %1034 = vmatprep.subr.bf16.mxu1 %v1120_v2  ;;  %v1062_v57 = vpack.c.bf16 %v442_v56, %v441_v54 }
  0x81   :  { %v54_v50 = vpop.permute.xlu0 %53 }
  0x82   :  { %v1320_v51 = vmul.f32 %v54_v50, %v49_v49  ;;  %v360_v49 = vld [vmem:[%s1592_s8 + $0x78] sm:$0xff] }
  0x83   :  { %v1056_v50 = vpack.c.bf16 %v360_v49, %v359_v48  ;;  %v548_v48 = vld [vmem:[%s1596_s12 + $0x78] sm:$0xff] }
  0x84   :  { %785 = vmatmul.mubr.f32.vlgmr.msra.gmra.mrb[0].mxu0 %v1320_v51 }
  0x85   :  { %854 = vmatprep.mubr.msk.f32.mxu0 %vm1121_vm0, %v1122_v8  ;;  %1012 = vmatpush3.bf16.msra.mxu0 %v1011_v58  ;;  %v443_v58 = vld [vmem:[%s1593_s10 + $0x20] sm:$0xff] }
  0x86   :  { %1013 = vmatprep.subr.bf16.mxu0 %v1120_v2 }
  0x89   :  { %1015 = vmatpush3.bf16.msra.mxu0 %v1014_v60  ;;  %v1065_v60 = vpack.c.bf16 %v444_v59, %v443_v58 }
  0x8a   :  { %1016 = vmatprep.subr.bf16.mxu0 %v1120_v2 }
  0x8d   :  { %1018 = vmatpush3.bf16.msra.mxu0 %v1017_v63  ;;  %v1068_v63 = vpack.c.bf16 %v446_v62, %v445_v61 }
  0x8e   :  { %1019 = vmatprep.subr.bf16.mxu0 %v1120_v2 }
  0x91   :  { %1021 = vmatpush3.bf16.msra.mxu0 %v1020_v3  ;;  %v1071_v3 = vpack.c.bf16 %v448_v1, %v447_v0 }
  0x92   :  { %1022 = vmatprep.subr.bf16.mxu0 %v1120_v2 }
  0x95   :  { %1024 = vmatpush3.bf16.msra.mxu0 %v1023_v6  ;;  %v1074_v6 = vpack.c.bf16 %v450_v5, %v449_v4 }
  0x96   :  { %1025 = vmatprep.subr.bf16.mxu0 %v1120_v2 }
  0x99   :  { %1027 = vmatpush3.bf16.msra.mxu0 %v1026_v10  ;;  %v1077_v10 = vpack.c.bf16 %v452_v9, %v451_v7 }
  0x9a   :  { %1028 = vmatprep.subr.bf16.mxu0 %v1120_v2 }
  0x9d   :  { %1030 = vmatpush3.bf16.msra.mxu0 %v1029_v13 }
  0x9e   :  { %1031 = vmatprep.subr.bf16.mxu0 %v1120_v2 }
  0xa1   :  { %1033 = vmatpush3.bf16.msra.mxu0 %v1032_v21  ;;  %v454_v21 = vld [vmem:[%s1593_s10 + $0x78] sm:$0xff] }
  0xa2   :  { %1058 = vmatprep.subr.bf16.mxu0 %v1120_v2 }
 0x157   :  { %v146_v15 = vpop.f32.mrb[0].mxu0 }
 0x158   :  { %v147_v16 = vadd.f32 %v642_v14, %v146_v15  ;;  %v786_v17 = vpop.f32.mrb[1].mxu0 }
 0x15a   :  { %v150_v18 = vmax.f32 %v147_v16, 0.0 }
 0x15c   :  { %820 = vmatmul.mubr.f32.vlgmr.msra.gmra.mrb[0].mxu1 %v150_v18 }
 0x15d   :  { %889 = vmatprep.mubr.msk.f32.mxu1 %vm1121_vm0, %v1122_v8  ;;  %1036 = vmatpush3.bf16.msra.mxu1 %v1035_v29  ;;  %v1089_v29 = vpack.c.bf16 %v538_v28, %v537_v27 }
 0x15e   :  { %1037 = vmatprep.subr.bf16.mxu1 %v1120_v2 }
 0x161   :  { %1039 = vmatpush3.bf16.msra.mxu1 %v1038_v32  ;;  %v1092_v32 = vpack.c.bf16 %v540_v31, %v539_v30 }
 0x162   :  { %1040 = vmatprep.subr.bf16.mxu1 %v1120_v2 }
 0x165   :  { %1042 = vmatpush3.bf16.msra.mxu1 %v1041_v35  ;;  %v1095_v35 = vpack.c.bf16 %v542_v34, %v541_v33 }
 0x166   :  { %1043 = vmatprep.subr.bf16.mxu1 %v1120_v2 }
 0x169   :  { %1045 = vmatpush3.bf16.msra.mxu1 %v1044_v38  ;;  %v1098_v38 = vpack.c.bf16 %v544_v37, %v543_v36 }
 0x16a   :  { %1046 = vmatprep.subr.bf16.mxu1 %v1120_v2 }
 0x16d   :  { %1048 = vmatpush3.bf16.msra.mxu1 %v1047_v41  ;;  %v1101_v41 = vpack.c.bf16 %v546_v40, %v545_v39 }
 0x16e   :  { %1049 = vmatprep.subr.bf16.mxu1 %v1120_v2 }
 0x171   :  { %1051 = vmatpush3.bf16.msra.mxu1 %v1050_v44 }
 0x172   :  { %1052 = vmatprep.subr.bf16.mxu1 %v1120_v2 }
 0x175   :  { %1054 = vmatpush3.bf16.msra.mxu1 %v1053_v47  ;;  %v547_v47 = vld [vmem:[%s1596_s12 + $0x70] sm:$0xff] }
 0x176   :  { %1055 = vmatprep.subr.bf16.mxu1 %v1120_v2  ;;  %v1104_v49 = vpack.c.bf16 %v548_v48, %v547_v47 }
 0x179   :  { %1057 = vmatpush3.bf16.msra.mxu1 %v1056_v50 }
 0x17a   :  { %1082 = vmatprep.subr.bf16.mxu1 %v1120_v2 }
 0x22f   :  { %v240_v23 = vpop.f32.mrb[0].mxu1 }
 0x230   :  { %v241_v24 = vadd.f32 %v643_v22, %v240_v23  ;;  %v821_v25 = vpop.f32.mrb[1].mxu1  ;;  %v1080_v22 = vpack.c.bf16 %v454_v21, %v453_v20  ;;  %v533_v23 = vld [vmem:[%s1596_s12] sm:$0xff] }
 0x231   :  { %v536_v25 = vld [vmem:[%s1596_s12 + $0x18] sm:$0xff] }
 0x232   :  { %v244_v26 = vmax.f32 %v241_v24, 0.0 }
 0x234   :  { %855 = vmatmul.mubr.f32.vlgmr.msra.gmra.mrb[2].mxu0 %v244_v26 }
 0x235   :  { %924 = vmatprep.mubr.msk.f32.mxu0 %vm1121_vm0, %v1122_v8  ;;  %1060 = vmatpush3.bf16.msra.mxu0 %v1059_v55  ;;  %v648_v55 = vld [vmem:[%s1599_s13] ss:$0 sm:$0xff] }
 0x236   :  { %1061 = vmatprep.subr.bf16.mxu0 %v1120_v2 }
 0x239   :  { %1063 = vmatpush3.bf16.msra.mxu0 %v1062_v57 }
 0x23a   :  { %1064 = vmatprep.subr.bf16.mxu0 %v1120_v2 }
 0x23d   :  { %1066 = vmatpush3.bf16.msra.mxu0 %v1065_v60 }
 0x23e   :  { %1067 = vmatprep.subr.bf16.mxu0 %v1120_v2 }
 0x241   :  { %1069 = vmatpush3.bf16.msra.mxu0 %v1068_v63 }
 0x242   :  { %1070 = vmatprep.subr.bf16.mxu0 %v1120_v2 }
 0x245   :  { %1072 = vmatpush3.bf16.msra.mxu0 %v1071_v3 }
 0x246   :  { %1073 = vmatprep.subr.bf16.mxu0 %v1120_v2 }
 0x249   :  { %1075 = vmatpush3.bf16.msra.mxu0 %v1074_v6 }
 0x24a   :  { %1076 = vmatprep.subr.bf16.mxu0 %v1120_v2 }
 0x24d   :  { %1078 = vmatpush3.bf16.msra.mxu0 %v1077_v10 }
 0x24e   :  { %1079 = vmatprep.subr.bf16.mxu0 %v1120_v2 }
 0x251   :  { %1081 = vmatpush3.bf16.msra.mxu0 %v1080_v22 }
 0x307   :  { %v334_v12 = vpop.f32.mrb[2].mxu0 }
 0x308   :  { %v335_v13 = vadd.f32 %v644_v11, %v334_v12  ;;  %v856_v14 = vpop.f32.mrb[3].mxu0 }
 0x30a   :  { %v645_v15 = vmul.f32 -1.442695, %v335_v13 }
 0x30c   :  { %1111 = vpow2.f32 %v645_v15 }
 0x316   :  { %v1112_v16 = vpop.eup %1111 }
 0x317   :  { %v341_v17 = vadd.f32 1.0, %v1112_v16 }
 0x319   :  { %1113 = vrcp.f32 %v341_v17 }
 0x323   :  { %v1114_v18 = vpop.eup %1113 }
 0x324   :  { %632 = vst [vmem:[%s1595_s14] sm:$0xff] %v1114_v18  ;;  %v344_v19 = vmul.f32 %v1114_v18, %v1320_v51  ;;  %v534_v51 = vld [vmem:[%s1596_s12 + $0x8] sm:$0xff] }
 0x325   :  { %v1083_v24 = vpack.c.bf16 %v534_v51, %v533_v23 }
 0x326   :  { %890 = vmatmul.mubr.f32.vlgmr.msra.gmra.mrb[2].mxu1 %v344_v19 }
 0x327   :  { %959 = vmatprep.mubr.msk.f32.mxu1 %vm1121_vm0, %v1122_v8  ;;  %v535_v8 = vld [vmem:[%s1596_s12 + $0x10] sm:$0xff]  ;;  %1084 = vmatpush3.bf16.msra.mxu1 %v1083_v24 }
 0x328   :  { %v1086_v26 = vpack.c.bf16 %v536_v25, %v535_v8  ;;  %1085 = vmatprep.subr.bf16.mxu1 %v1120_v2 }
 0x32b   :  { %1087 = vmatpush3.bf16.msra.mxu1 %v1086_v26 }
 0x32c   :  { %1088 = vmatprep.subr.bf16.mxu1 %v1120_v2 }
 0x32f   :  { %1090 = vmatpush3.bf16.msra.mxu1 %v1089_v29 }
 0x330   :  { %1091 = vmatprep.subr.bf16.mxu1 %v1120_v2 }
 0x333   :  { %1093 = vmatpush3.bf16.msra.mxu1 %v1092_v32 }
 0x334   :  { %1094 = vmatprep.subr.bf16.mxu1 %v1120_v2 }
 0x337   :  { %1096 = vmatpush3.bf16.msra.mxu1 %v1095_v35 }
 0x338   :  { %1097 = vmatprep.subr.bf16.mxu1 %v1120_v2 }
 0x33b   :  { %1099 = vmatpush3.bf16.msra.mxu1 %v1098_v38 }
 0x33c   :  { %1100 = vmatprep.subr.bf16.mxu1 %v1120_v2 }
 0x33f   :  { %1102 = vmatpush3.bf16.msra.mxu1 %v1101_v41 }
 0x340   :  { %1103 = vmatprep.subr.bf16.mxu1 %v1120_v2  ;;  %v647_v2 = vld [vmem:[%s1598_s11] ss:$0 sm:$0xff] }
 0x343   :  { %1105 = vmatpush3.bf16.msra.mxu1 %v1104_v49 }
 0x3f9   :  { %v434_v43 = vpop.f32.mrb[2].mxu1 }
 0x3fa   :  { %v435_v44 = vadd.f32 %v646_v42, %v434_v43  ;;  %v891_v45 = vpop.f32.mrb[3].mxu1 }
 0x3fc   :  { %v438_v46 = vmax.f32 %v435_v44, 0.0 }
 0x3fe   :  { %925 = vmatmul.mubr.f32.vlgmr.msra.gmra.mrb[4].mxu0 %v438_v46 }
 0x4d1   :  { %v528_v50 = vpop.f32.mrb[4].mxu0 }
 0x4d2   :  { %v529_v52 = vadd.f32 %v647_v2, %v528_v50  ;;  %v926_v53 = vpop.f32.mrb[5].mxu0 }
 0x4d4   :  { %v532_v54 = vmax.f32 %v529_v52, 0.0 }
 0x4d6   :  { %960 = vmatmul.mubr.f32.vlgmr.msra.gmra.mrb[4].mxu1 %v532_v54 }
 0x5a9   :  { %v622_v56 = vpop.f32.mrb[4].mxu1 }
 0x5aa   :  { %v623_v57 = vadd.f32 %v648_v55, %v622_v56  ;;  %v961_v58 = vpop.f32.mrb[5].mxu1 }
 0x5ac   :  { %v649_v59 = vmul.f32 -1.442695, %v623_v57 }
 0x5ae   :  { %1115 = vpow2.f32 %v649_v59 }
 0x5b8   :  { %v1116_v60 = vpop.eup %1115 }
 0x5b9   :  { %v629_v61 = vadd.f32 1.0, %v1116_v60 }
 0x5bb   :  { %1117 = vrcp.f32 %v629_v61 }
 0x5c5   :  { %v1118_v62 = vpop.eup %1117 }
 0x5c6   :  { %633 = vst [vmem:[%s1600_s15] sm:$0xff] %v1118_v62 }

</bundles_post_ra>
